<compile_context>
chip_gen: v7x
topology: tpu7x:2x2x1
jax: 0.10.0
libtpu: 0.0.40
codegen_flags: <defaults>
</compile_context>

<pallas_src>
import jax
import jax.numpy as jnp
import numpy as np
from jax import lax
from jax.experimental import pallas as pl
from jax.experimental.pallas import tpu as pltpu


def _cdiv(a, b):
    return -(-a // b)


def _round_up(a, b):
    return _cdiv(a, b) * b


def _pick_sp_tile():
    """Per-generation Sp tile (rows of 128 patches per grid step)."""
    try:
        kind = jax.devices()[0].device_kind.lower()
    except Exception:
        return 32
    if "v6" in kind or "trillium" in kind:
        return 64   # 32 MiB scoped default / 128 MiB physical
    # v5e (16 MiB scoped default) and v7x (64 MiB physical VMEM per TC)
    return 32


# Channel layout inside the fused input slab (N, C):
_CH_IDR, _CH_SG, _CH_GT, _CH_MASK, _CH_OM, _CH_SDF, _CH_NRM = 0, 3, 6, 9, 10, 11, 12


def _make_pix_kernel(alpha, patch_k, ts, num_patch, compute_smooth, use_l2):
    """Gridded kernel: lane-dense partial sums of all per-pixel statistics.

    Input block  : (K, C, TS, 128)  -- K in-patch pixels, C channels, TS
                   sublane rows of 128 patches.
    Output block : (6, TS, 128)     -- [mask count, L1/L2 idr sum, L1/L2 sg
                   sum, BCE sum, masked variance sum, all-inside patch count].
    """
    neg_alpha = -float(alpha)
    inv_k = 1.0 / float(patch_k)
    inv_km1 = 1.0 / float(max(patch_k - 1, 1))

    def img_diff(a, b):
        d = a - b
        return d * d if use_l2 else jnp.abs(d)

    def kernel(x_ref, pix_ref):
        i = pl.program_id(0)
        rows = lax.broadcasted_iota(jnp.int32, (ts, 128), 0)
        lanes = lax.broadcasted_iota(jnp.int32, (ts, 128), 1)
        gid = (i * ts + rows) * 128 + lanes
        valid = (gid < num_patch).astype(jnp.float32)   # in-kernel pad mask

        zeros = jnp.zeros((ts, 128), jnp.float32)
        ones = jnp.ones((ts, 128), jnp.float32)

        def body(k, carry):
            if compute_smooth:
                cnt, s_idr, s_sg, s_bce, p_all, n0, n1, n2 = carry
            else:
                cnt, s_idr, s_sg, s_bce, p_all = carry

            m = x_ref[k, _CH_MASK]          # mask_and   (TS, 128)
            om = x_ref[k, _CH_OM]           # object_mask
            sdf = x_ref[k, _CH_SDF]

            d_idr = zeros
            d_sg = zeros
            for c in range(3):
                gt_c = x_ref[k, _CH_GT + c]
                d_idr = d_idr + img_diff(x_ref[k, _CH_IDR + c], gt_c)
                d_sg = d_sg + img_diff(x_ref[k, _CH_SG + c], gt_c)

            cnt = cnt + m
            s_idr = s_idr + d_idr * m
            s_sg = s_sg + d_sg * m

            # BCE-with-logits on ~(net & obj) pixels; pad lanes have
            # valid == 0 and m == 0 so they contribute nothing.
            x = neg_alpha * sdf
            bce = (jnp.maximum(x, 0.0) - x * om
                   + jnp.log1p(jnp.exp(-jnp.abs(x))))
            s_bce = s_bce + bce * (valid - m)

            p_all = jnp.minimum(p_all, m)   # patch fully inside object?

            if compute_smooth:
                n0 = n0 + x_ref[k, _CH_NRM + 0]
                n1 = n1 + x_ref[k, _CH_NRM + 1]
                n2 = n2 + x_ref[k, _CH_NRM + 2]
                return cnt, s_idr, s_sg, s_bce, p_all, n0, n1, n2
            return cnt, s_idr, s_sg, s_bce, p_all

        if compute_smooth:
            init = (zeros, zeros, zeros, zeros, ones, zeros, zeros, zeros)
            cnt, s_idr, s_sg, s_bce, p_all, n0, n1, n2 = lax.fori_loop(
                0, patch_k, body, init)
        else:
            init = (zeros, zeros, zeros, zeros, ones)
            cnt, s_idr, s_sg, s_bce, p_all = lax.fori_loop(
                0, patch_k, body, init)

        pix_ref[0] = cnt
        pix_ref[1] = s_idr
        pix_ref[2] = s_sg
        pix_ref[3] = s_bce

        if compute_smooth:
            # Two-pass unbiased variance over K per channel (numerically safe).
            mean = (n0 * inv_k, n1 * inv_k, n2 * inv_k)

            def var_body(k, acc):
                for c in range(3):
                    d = x_ref[k, _CH_NRM + c] - mean[c]
                    acc = acc + d * d
                return acc

            var_acc = lax.fori_loop(0, patch_k, var_body, zeros)
            pix_ref[4] = var_acc * inv_km1 * p_all
            pix_ref[5] = p_all
        else:
            pix_ref[4] = zeros
            pix_ref[5] = zeros

    return kernel


def _eik_kernel(g_ref, out_ref):
    # g_ref: (3, Sg, 128); pad rows are unit vectors -> zero contribution.
    g0 = g_ref[0]
    g1 = g_ref[1]
    g2 = g_ref[2]
    nsq = g0 * g0 + g1 * g1 + g2 * g2
    out_ref[...] = (jnp.sqrt(nsq) - 1.0) ** 2


def idr_loss_pallas(model_outputs, ground_truth, *, idr_rgb_weight,
                    sg_rgb_weight, eikonal_weight, mask_weight, alpha,
                    r_patch=-1, normalsmooth_weight=0.0, loss_type='L1'):
    assert loss_type in ('L1', 'L2')
    use_l2 = (loss_type == 'L2')

    rgb_gt = ground_truth['rgb'].reshape(-1, 3).astype(jnp.float32)
    idr_rgb = model_outputs['idr_rgb_values'].reshape(-1, 3).astype(jnp.float32)
    sg_rgb = model_outputs['sg_rgb_values'].reshape(-1, 3).astype(jnp.float32)
    net_mask = model_outputs['network_object_mask'].reshape(-1).astype(bool)
    obj_mask = model_outputs['object_mask'].reshape(-1).astype(bool)
    sdf = model_outputs['sdf_output'].reshape(-1).astype(jnp.float32)
    grad_theta = model_outputs['grad_theta'].reshape(-1, 3).astype(jnp.float32)
    normal = model_outputs['normal_values'].reshape(-1, 3).astype(jnp.float32)

    n_pix = int(obj_mask.shape[0])
    use_patch = (int(r_patch) >= 1) and (normalsmooth_weight != 0.0)
    patch_k = 4 * int(r_patch) * int(r_patch) if use_patch else 1
    assert n_pix % patch_k == 0, "pixel count must be divisible by patch size"
    num_patch = n_pix // patch_k

    mask_and_f = (net_mask & obj_mask).astype(jnp.float32)
    om_f = obj_mask.astype(jnp.float32)

    # --- single fused lane-major layout pass -------------------------------
    cols = [idr_rgb, sg_rgb, rgb_gt, mask_and_f[:, None], om_f[:, None],
            sdf[:, None]]
    if use_patch:
        cols.append(normal)
    stacked = jnp.concatenate(cols, axis=-1)          # (N, C)  C = 12 or 15
    n_ch = int(stacked.shape[-1])

    ts_pref = _pick_sp_tile()
    sp_min = max(_cdiv(num_patch, 128), 1)
    sp8 = _round_up(sp_min, 8)                        # sublane-dense
    ts = min(ts_pref, sp8)
    sp_pad = _round_up(sp8, ts)
    n_tiles = sp_pad // ts

    x = stacked.reshape(num_patch, patch_k, n_ch)
    pad = sp_pad * 128 - num_patch
    if pad:
        x = jnp.pad(x, ((0, pad), (0, 0), (0, 0)))
    # (P_pad, K, C) -> (K, C, P_pad) -> (K, C, Sp_pad, 128): one transpose.
    x = jnp.transpose(x, (1, 2, 0)).reshape(patch_k, n_ch, sp_pad, 128)

    pix_stats = pl.pallas_call(
        _make_pix_kernel(float(alpha), patch_k, ts, num_patch, use_patch,
                         use_l2),
        out_shape=jax.ShapeDtypeStruct((6, sp_pad, 128), jnp.float32),
        grid=(n_tiles,),
        in_specs=[pl.BlockSpec((patch_k, n_ch, ts, 128),
                               lambda i: (0, 0, i, 0))],
        out_specs=pl.BlockSpec((6, ts, 128), lambda i: (0, i, 0)),
        compiler_params=pltpu.CompilerParams(
            dimension_semantics=("parallel",)),
    )(x)

    # --- eikonal term (small separate kernel) -------------------------------
    n_grad = int(grad_theta.shape[0])
    if n_grad > 0:
        sg_rows = _round_up(max(_cdiv(n_grad, 128), 1), 8)
        pad_rows = sg_rows * 128 - n_grad
        if pad_rows:
            unit = jnp.zeros((pad_rows, 3), jnp.float32).at[:, 0].set(1.0)
            grad_full = jnp.concatenate([grad_theta, unit], axis=0)
        else:
            grad_full = grad_theta
        grad_p = jnp.transpose(grad_full, (1, 0)).reshape(3, sg_rows, 128)
        vspec = pl.BlockSpec(memory_space=pltpu.MemorySpace.VMEM)
        eik_part = pl.pallas_call(
            _eik_kernel,
            out_shape=jax.ShapeDtypeStruct((sg_rows, 128), jnp.float32),
            in_specs=[vspec],
            out_specs=vspec,
        )(grad_p)
        eikonal_loss = jnp.sum(eik_part) / float(n_grad)
    else:
        eikonal_loss = jnp.float32(0.0)

    # --- tiny final reductions + scalar weighting in plain JAX --------------
    sums = jnp.sum(pix_stats, axis=(1, 2))            # (6,)
    cnt_mask, s_idr, s_sg, bce_sum, var_sum, patch_cnt = (
        sums[0], sums[1], sums[2], sums[3], sums[4], sums[5])

    denom_rgb = jnp.maximum(cnt_mask * 3.0, 1.0)
    idr_rgb_loss = jnp.where(cnt_mask > 0, s_idr / denom_rgb, 0.0)
    sg_rgb_loss = jnp.where(cnt_mask > 0, s_sg / denom_rgb, 0.0)

    cnt_not = float(n_pix) - cnt_mask
    mask_loss = jnp.where(cnt_not > 0,
                          (1.0 / float(alpha)) * bce_sum / float(n_pix), 0.0)

    if use_patch:
        normalsmooth_loss = jnp.where(
            patch_cnt > 0, var_sum / jnp.maximum(patch_cnt * 3.0, 1.0), 0.0)
    else:
        normalsmooth_loss = jnp.float32(0.0)

    loss = (idr_rgb_weight * idr_rgb_loss + sg_rgb_weight * sg_rgb_loss
            + eikonal_weight * eikonal_loss + mask_weight * mask_loss
            + normalsmooth_weight * normalsmooth_loss)

    return {'loss': loss, 'idr_rgb_loss': idr_rgb_loss,
            'sg_rgb_loss': sg_rgb_loss, 'eikonal_loss': eikonal_loss,
            'mask_loss': mask_loss, 'normalsmooth_loss': normalsmooth_loss}


def _idr_loss_ref_numpy(model_outputs, ground_truth, *, idr_rgb_weight,
                        sg_rgb_weight, eikonal_weight, mask_weight, alpha,
                        r_patch, normalsmooth_weight):
    """Pure-numpy mirror of the PyTorch IDRLoss.forward (verification only)."""
    f = lambda a: np.asarray(a, dtype=np.float64)
    rgb_gt = f(ground_truth['rgb']).reshape(-1, 3)
    idr = f(model_outputs['idr_rgb_values'])
    sg = f(model_outputs['sg_rgb_values'])
    nm = np.asarray(model_outputs['network_object_mask'], dtype=bool)
    om = np.asarray(model_outputs['object_mask'], dtype=bool)
    sdf = f(model_outputs['sdf_output']).reshape(-1)
    grad = f(model_outputs['grad_theta'])
    normal = f(model_outputs['normal_values'])

    mask = nm & om
    if mask.sum() == 0:
        idr_l, sg_l = 0.0, 0.0
    else:
        idr_l = np.mean(np.abs(idr[mask] - rgb_gt[mask]))
        sg_l = np.mean(np.abs(sg[mask] - rgb_gt[mask]))

    nmask = ~mask
    if nmask.sum() == 0:
        mask_l = 0.0
    else:
        x = -alpha * sdf[nmask]
        g = om[nmask].astype(np.float64)
        bce = np.maximum(x, 0.0) - x * g + np.log1p(np.exp(-np.abs(x)))
        mask_l = (1.0 / alpha) * bce.sum() / float(om.shape[0])

    eik_l = (np.mean((np.linalg.norm(grad, axis=1) - 1.0) ** 2)
             if grad.shape[0] > 0 else 0.0)

    if int(r_patch) < 1 or normalsmooth_weight == 0.0:
        ns_l = 0.0
    else:
        k = 4 * int(r_patch) * int(r_patch)
        pm = mask.reshape(-1, k).all(axis=-1)
        if pm.sum() == 0:
            ns_l = 0.0
        else:
            nr = normal.reshape(-1, k, 3)
            var = nr.var(axis=1, ddof=1)
            ns_l = var[pm].mean()

    loss = (idr_rgb_weight * idr_l + sg_rgb_weight * sg_l
            + eikonal_weight * eik_l + mask_weight * mask_l
            + normalsmooth_weight * ns_l)
    return {'loss': loss, 'idr_rgb_loss': idr_l, 'sg_rgb_loss': sg_l,
            'eikonal_loss': eik_l, 'mask_loss': mask_l,
            'normalsmooth_loss': ns_l}


if __name__ == "__main__":
    params = dict(idr_rgb_weight=1.0, sg_rgb_weight=1.0, eikonal_weight=0.1,
                  mask_weight=100.0, alpha=50.0, r_patch=2,
                  normalsmooth_weight=0.1)

    r_patch = params['r_patch']
    K = 4 * r_patch * r_patch        # 16 pixels per patch
    N = 512                          # total rays/pixels (multiple of K)
    M = 64                           # eikonal sample points

    key = jax.random.PRNGKey(0)
    ks = jax.random.split(key, 8)
    idr_rgb = jax.random.uniform(ks[0], (N, 3), jnp.float32)
    sg_rgb = jax.random.uniform(ks[1], (N, 3), jnp.float32)
    rgb_gt = jax.random.uniform(ks[2], (1, N, 3), jnp.float32)
    net_mask = jax.random.bernoulli(ks[3], 0.7, (N,))
    obj_mask = jax.random.bernoulli(ks[4], 0.7, (N,))
    # make the first 4 patches fully inside the object so the normal-smooth
    # term is exercised (all-true patches)
    net_mask = net_mask.at[:4 * K].set(True)
    obj_mask = obj_mask.at[:4 * K].set(True)
    sdf_output = jax.random.normal(ks[5], (N, 1), jnp.float32) * 0.1
    grad_theta = jax.random.normal(ks[6], (M, 3), jnp.float32)
    normal_values = jax.random.normal(ks[7], (N, 3), jnp.float32)

    model_outputs = {
        'idr_rgb_values': idr_rgb,
        'sg_rgb_values': sg_rgb,
        'network_object_mask': net_mask,
        'object_mask': obj_mask,
        'sdf_output': sdf_output,
        'grad_theta': grad_theta,
        'normal_values': normal_values,
    }
    ground_truth = {'rgb': rgb_gt}

    out = idr_loss_pallas(model_outputs, ground_truth, **params)
    jax.block_until_ready(out['loss'])

    ref = _idr_loss_ref_numpy(model_outputs, ground_truth, **params)
    for name in ('idr_rgb_loss', 'sg_rgb_loss', 'eikonal_loss', 'mask_loss',
                 'normalsmooth_loss', 'loss'):
        got = float(out[name])
        want = float(ref[name])
        assert abs(got - want) <= 1e-3 + 1e-3 * abs(want), (
            f"{name}: pallas={got} ref={want}")

    print("KERNEL_OK")
</pallas_src>

<mosaic_0001>
module attributes {stable_mosaic.version = 11 : i64} {
  func.func @kernel(%arg0: i32, %arg1: memref<16x15x8x128xf32, #tpu.memory_space<vmem>>, %arg2: memref<6x8x128xf32, #tpu.memory_space<vmem>>) attributes {dimension_semantics = [#tpu.dimension_semantics<parallel>], iteration_bounds = array<i64: 1>, scalar_prefetch = 0 : i64, scratch_operands = 0 : i64, tpu.core_type = #tpu.core_type<tc>, window_params = [{transform_indices = @transform_0, window_bounds = array<i64: 16, 15, 8, 128>}, {transform_indices = @transform_1, window_bounds = array<i64: 6, 8, 128>}]} {
    %0 = tpu.iota {dimensions = array<i32: 0>} : vector<8x128xi32>
    %1 = tpu.iota {dimensions = array<i32: 1>} : vector<8x128xi32>
    %c8_i32 = arith.constant 8 : i32
    %2 = arith.muli %arg0, %c8_i32 : i32
    %3 = vector.broadcast %2 : i32 to vector<8x128xi32>
    %4 = arith.addi %3, %0 : vector<8x128xi32>
    %c128_i32 = arith.constant 128 : i32
    %5 = vector.broadcast %c128_i32 : i32 to vector<8x128xi32>
    %6 = arith.muli %4, %5 : vector<8x128xi32>
    %7 = arith.addi %6, %1 : vector<8x128xi32>
    %c32_i32 = arith.constant 32 : i32
    %8 = vector.broadcast %c32_i32 : i32 to vector<8x128xi32>
    %9 = arith.cmpi slt, %7, %8 : vector<8x128xi32>
    %10 = arith.extui %9 : vector<8x128xi1> to vector<8x128xi32>
    %11 = arith.sitofp %10 : vector<8x128xi32> to vector<8x128xf32>
    %cst = arith.constant 0.000000e+00 : f32
    %12 = vector.broadcast %cst : f32 to vector<8x128xf32>
    %cst_0 = arith.constant 1.000000e+00 : f32
    %13 = vector.broadcast %cst_0 : f32 to vector<8x128xf32>
    %c0_i32 = arith.constant 0 : i32
    %c16_i32 = arith.constant 16 : i32
    %14 = arith.addi %c0_i32, %c16_i32 : i32
    %c1_i32 = arith.constant 1 : i32
    %15:8 = scf.for %arg3 = %c0_i32 to %14 step %c1_i32 iter_args(%arg4 = %12, %arg5 = %12, %arg6 = %12, %arg7 = %12, %arg8 = %13, %arg9 = %12, %arg10 = %12, %arg11 = %12) -> (vector<8x128xf32>, vector<8x128xf32>, vector<8x128xf32>, vector<8x128xf32>, vector<8x128xf32>, vector<8x128xf32>, vector<8x128xf32>, vector<8x128xf32>)  : i32 {
      %45 = arith.index_cast %arg3 : i32 to index
      %c9 = arith.constant 9 : index
      %c0_22 = arith.constant 0 : index
      %c0_23 = arith.constant 0 : index
      %46 = vector.load %arg1[%45, %c9, %c0_22, %c0_23] : memref<16x15x8x128xf32, #tpu.memory_space<vmem>>, vector<1x1x8x128xf32>
      %47 = vector.shape_cast %46 : vector<1x1x8x128xf32> to vector<8x128xf32>
      %48 = arith.index_cast %arg3 : i32 to index
      %c10 = arith.constant 10 : index
      %c0_24 = arith.constant 0 : index
      %c0_25 = arith.constant 0 : index
      %49 = vector.load %arg1[%48, %c10, %c0_24, %c0_25] : memref<16x15x8x128xf32, #tpu.memory_space<vmem>>, vector<1x1x8x128xf32>
      %50 = vector.shape_cast %49 : vector<1x1x8x128xf32> to vector<8x128xf32>
      %51 = arith.index_cast %arg3 : i32 to index
      %c11 = arith.constant 11 : index
      %c0_26 = arith.constant 0 : index
      %c0_27 = arith.constant 0 : index
      %52 = vector.load %arg1[%51, %c11, %c0_26, %c0_27] : memref<16x15x8x128xf32, #tpu.memory_space<vmem>>, vector<1x1x8x128xf32>
      %53 = vector.shape_cast %52 : vector<1x1x8x128xf32> to vector<8x128xf32>
      %54 = arith.index_cast %arg3 : i32 to index
      %c6 = arith.constant 6 : index
      %c0_28 = arith.constant 0 : index
      %c0_29 = arith.constant 0 : index
      %55 = vector.load %arg1[%54, %c6, %c0_28, %c0_29] : memref<16x15x8x128xf32, #tpu.memory_space<vmem>>, vector<1x1x8x128xf32>
      %56 = vector.shape_cast %55 : vector<1x1x8x128xf32> to vector<8x128xf32>
      %57 = arith.index_cast %arg3 : i32 to index
      %c0_30 = arith.constant 0 : index
      %c0_31 = arith.constant 0 : index
      %c0_32 = arith.constant 0 : index
      %58 = vector.load %arg1[%57, %c0_30, %c0_31, %c0_32] : memref<16x15x8x128xf32, #tpu.memory_space<vmem>>, vector<1x1x8x128xf32>
      %59 = vector.shape_cast %58 : vector<1x1x8x128xf32> to vector<8x128xf32>
      %60 = arith.subf %59, %56 : vector<8x128xf32>
      %61 = math.absf %60 : vector<8x128xf32>
      %62 = arith.addf %12, %61 : vector<8x128xf32>
      %63 = arith.index_cast %arg3 : i32 to index
      %c3_33 = arith.constant 3 : index
      %c0_34 = arith.constant 0 : index
      %c0_35 = arith.constant 0 : index
      %64 = vector.load %arg1[%63, %c3_33, %c0_34, %c0_35] : memref<16x15x8x128xf32, #tpu.memory_space<vmem>>, vector<1x1x8x128xf32>
      %65 = vector.shape_cast %64 : vector<1x1x8x128xf32> to vector<8x128xf32>
      %66 = arith.subf %65, %56 : vector<8x128xf32>
      %67 = math.absf %66 : vector<8x128xf32>
      %68 = arith.addf %12, %67 : vector<8x128xf32>
      %69 = arith.index_cast %arg3 : i32 to index
      %c7 = arith.constant 7 : index
      %c0_36 = arith.constant 0 : index
      %c0_37 = arith.constant 0 : index
      %70 = vector.load %arg1[%69, %c7, %c0_36, %c0_37] : memref<16x15x8x128xf32, #tpu.memory_space<vmem>>, vector<1x1x8x128xf32>
      %71 = vector.shape_cast %70 : vector<1x1x8x128xf32> to vector<8x128xf32>
      %72 = arith.index_cast %arg3 : i32 to index
      %c1_38 = arith.constant 1 : index
      %c0_39 = arith.constant 0 : index
      %c0_40 = arith.constant 0 : index
      %73 = vector.load %arg1[%72, %c1_38, %c0_39, %c0_40] : memref<16x15x8x128xf32, #tpu.memory_space<vmem>>, vector<1x1x8x128xf32>
      %74 = vector.shape_cast %73 : vector<1x1x8x128xf32> to vector<8x128xf32>
      %75 = arith.subf %74, %71 : vector<8x128xf32>
      %76 = math.absf %75 : vector<8x128xf32>
      %77 = arith.addf %62, %76 : vector<8x128xf32>
      %78 = arith.index_cast %arg3 : i32 to index
      %c4_41 = arith.constant 4 : index
      %c0_42 = arith.constant 0 : index
      %c0_43 = arith.constant 0 : index
      %79 = vector.load %arg1[%78, %c4_41, %c0_42, %c0_43] : memref<16x15x8x128xf32, #tpu.memory_space<vmem>>, vector<1x1x8x128xf32>
      %80 = vector.shape_cast %79 : vector<1x1x8x128xf32> to vector<8x128xf32>
      %81 = arith.subf %80, %71 : vector<8x128xf32>
      %82 = math.absf %81 : vector<8x128xf32>
      %83 = arith.addf %68, %82 : vector<8x128xf32>
      %84 = arith.index_cast %arg3 : i32 to index
      %c8 = arith.constant 8 : index
      %c0_44 = arith.constant 0 : index
      %c0_45 = arith.constant 0 : index
      %85 = vector.load %arg1[%84, %c8, %c0_44, %c0_45] : memref<16x15x8x128xf32, #tpu.memory_space<vmem>>, vector<1x1x8x128xf32>
      %86 = vector.shape_cast %85 : vector<1x1x8x128xf32> to vector<8x128xf32>
      %87 = arith.index_cast %arg3 : i32 to index
      %c2_46 = arith.constant 2 : index
      %c0_47 = arith.constant 0 : index
      %c0_48 = arith.constant 0 : index
      %88 = vector.load %arg1[%87, %c2_46, %c0_47, %c0_48] : memref<16x15x8x128xf32, #tpu.memory_space<vmem>>, vector<1x1x8x128xf32>
      %89 = vector.shape_cast %88 : vector<1x1x8x128xf32> to vector<8x128xf32>
      %90 = arith.subf %89, %86 : vector<8x128xf32>
      %91 = math.absf %90 : vector<8x128xf32>
      %92 = arith.addf %77, %91 : vector<8x128xf32>
      %93 = arith.index_cast %arg3 : i32 to index
      %c5_49 = arith.constant 5 : index
      %c0_50 = arith.constant 0 : index
      %c0_51 = arith.constant 0 : index
      %94 = vector.load %arg1[%93, %c5_49, %c0_50, %c0_51] : memref<16x15x8x128xf32, #tpu.memory_space<vmem>>, vector<1x1x8x128xf32>
      %95 = vector.shape_cast %94 : vector<1x1x8x128xf32> to vector<8x128xf32>
      %96 = arith.subf %95, %86 : vector<8x128xf32>
      %97 = math.absf %96 : vector<8x128xf32>
      %98 = arith.addf %83, %97 : vector<8x128xf32>
      %99 = arith.addf %arg4, %47 : vector<8x128xf32>
      %100 = arith.mulf %92, %47 : vector<8x128xf32>
      %101 = arith.addf %arg5, %100 : vector<8x128xf32>
      %102 = arith.mulf %98, %47 : vector<8x128xf32>
      %103 = arith.addf %arg6, %102 : vector<8x128xf32>
      %cst_52 = arith.constant -5.000000e+01 : f32
      %104 = vector.broadcast %cst_52 : f32 to vector<8x128xf32>
      %105 = arith.mulf %104, %53 : vector<8x128xf32>
      %cst_53 = arith.constant 0.000000e+00 : f32
      %106 = vector.broadcast %cst_53 : f32 to vector<8x128xf32>
      %107 = arith.maximumf %105, %106 : vector<8x128xf32>
      %108 = arith.mulf %105, %50 : vector<8x128xf32>
      %109 = arith.subf %107, %108 : vector<8x128xf32>
      %110 = math.absf %105 : vector<8x128xf32>
      %cst_54 = arith.constant 0.000000e+00 : f32
      %111 = vector.broadcast %cst_54 : f32 to vector<8x128xf32>
      %112 = arith.subf %111, %110 : vector<8x128xf32>
      %113 = math.exp %112 : vector<8x128xf32>
      %114 = math.log1p %113 : vector<8x128xf32>
      %115 = arith.addf %109, %114 : vector<8x128xf32>
      %116 = arith.subf %11, %47 : vector<8x128xf32>
      %117 = arith.mulf %115, %116 : vector<8x128xf32>
      %118 = arith.addf %arg7, %117 : vector<8x128xf32>
      %119 = arith.minimumf %arg8, %47 : vector<8x128xf32>
      %120 = arith.index_cast %arg3 : i32 to index
      %c12 = arith.constant 12 : index
      %c0_55 = arith.constant 0 : index
      %c0_56 = arith.constant 0 : index
      %121 = vector.load %arg1[%120, %c12, %c0_55, %c0_56] : memref<16x15x8x128xf32, #tpu.memory_space<vmem>>, vector<1x1x8x128xf32>
      %122 = vector.shape_cast %121 : vector<1x1x8x128xf32> to vector<8x128xf32>
      %123 = arith.addf %arg9, %122 : vector<8x128xf32>
      %124 = arith.index_cast %arg3 : i32 to index
      %c13 = arith.constant 13 : index
      %c0_57 = arith.constant 0 : index
      %c0_58 = arith.constant 0 : index
      %125 = vector.load %arg1[%124, %c13, %c0_57, %c0_58] : memref<16x15x8x128xf32, #tpu.memory_space<vmem>>, vector<1x1x8x128xf32>
      %126 = vector.shape_cast %125 : vector<1x1x8x128xf32> to vector<8x128xf32>
      %127 = arith.addf %arg10, %126 : vector<8x128xf32>
      %128 = arith.index_cast %arg3 : i32 to index
      %c14 = arith.constant 14 : index
      %c0_59 = arith.constant 0 : index
      %c0_60 = arith.constant 0 : index
      %129 = vector.load %arg1[%128, %c14, %c0_59, %c0_60] : memref<16x15x8x128xf32, #tpu.memory_space<vmem>>, vector<1x1x8x128xf32>
      %130 = vector.shape_cast %129 : vector<1x1x8x128xf32> to vector<8x128xf32>
      %131 = arith.addf %arg11, %130 : vector<8x128xf32>
      scf.yield %99, %101, %103, %118, %119, %123, %127, %131 : vector<8x128xf32>, vector<8x128xf32>, vector<8x128xf32>, vector<8x128xf32>, vector<8x128xf32>, vector<8x128xf32>, vector<8x128xf32>, vector<8x128xf32>
    }
    %c16_i32_1 = arith.constant 16 : i32
    %c0 = arith.constant 0 : index
    %c0_2 = arith.constant 0 : index
    %c0_3 = arith.constant 0 : index
    %16 = vector.load %arg2[%c0, %c0_2, %c0_3] : memref<6x8x128xf32, #tpu.memory_space<vmem>>, vector<1x8x128xf32>
    %17 = vector.shape_cast %16 : vector<1x8x128xf32> to vector<8x128xf32>
    %18 = vector.shape_cast %15#0 : vector<8x128xf32> to vector<1x8x128xf32>
    tpu.vector_store %arg2[%c0, %c0_2, %c0_3], %18 {strides = array<i32>} : memref<6x8x128xf32, #tpu.memory_space<vmem>>, vector<1x8x128xf32>,
    %c1 = arith.constant 1 : index
    %c0_4 = arith.constant 0 : index
    %c0_5 = arith.constant 0 : index
    %19 = vector.load %arg2[%c1, %c0_4, %c0_5] : memref<6x8x128xf32, #tpu.memory_space<vmem>>, vector<1x8x128xf32>
    %20 = vector.shape_cast %19 : vector<1x8x128xf32> to vector<8x128xf32>
    %21 = vector.shape_cast %15#1 : vector<8x128xf32> to vector<1x8x128xf32>
    tpu.vector_store %arg2[%c1, %c0_4, %c0_5], %21 {strides = array<i32>} : memref<6x8x128xf32, #tpu.memory_space<vmem>>, vector<1x8x128xf32>,
    %c2 = arith.constant 2 : index
    %c0_6 = arith.constant 0 : index
    %c0_7 = arith.constant 0 : index
    %22 = vector.load %arg2[%c2, %c0_6, %c0_7] : memref<6x8x128xf32, #tpu.memory_space<vmem>>, vector<1x8x128xf32>
    %23 = vector.shape_cast %22 : vector<1x8x128xf32> to vector<8x128xf32>
    %24 = vector.shape_cast %15#2 : vector<8x128xf32> to vector<1x8x128xf32>
    tpu.vector_store %arg2[%c2, %c0_6, %c0_7], %24 {strides = array<i32>} : memref<6x8x128xf32, #tpu.memory_space<vmem>>, vector<1x8x128xf32>,
    %c3 = arith.constant 3 : index
    %c0_8 = arith.constant 0 : index
    %c0_9 = arith.constant 0 : index
    %25 = vector.load %arg2[%c3, %c0_8, %c0_9] : memref<6x8x128xf32, #tpu.memory_space<vmem>>, vector<1x8x128xf32>
    %26 = vector.shape_cast %25 : vector<1x8x128xf32> to vector<8x128xf32>
    %27 = vector.shape_cast %15#3 : vector<8x128xf32> to vector<1x8x128xf32>
    tpu.vector_store %arg2[%c3, %c0_8, %c0_9], %27 {strides = array<i32>} : memref<6x8x128xf32, #tpu.memory_space<vmem>>, vector<1x8x128xf32>,
    %cst_10 = arith.constant 6.250000e-02 : f32
    %28 = vector.broadcast %cst_10 : f32 to vector<8x128xf32>
    %29 = arith.mulf %15#5, %28 : vector<8x128xf32>
    %cst_11 = arith.constant 6.250000e-02 : f32
    %30 = vector.broadcast %cst_11 : f32 to vector<8x128xf32>
    %31 = arith.mulf %15#6, %30 : vector<8x128xf32>
    %cst_12 = arith.constant 6.250000e-02 : f32
    %32 = vector.broadcast %cst_12 : f32 to vector<8x128xf32>
    %33 = arith.mulf %15#7, %32 : vector<8x128xf32>
    %c0_i32_13 = arith.constant 0 : i32
    %c16_i32_14 = arith.constant 16 : i32
    %34 = arith.addi %c0_i32_13, %c16_i32_14 : i32
    %c1_i32_15 = arith.constant 1 : i32
    %35 = scf.for %arg3 = %c0_i32_13 to %34 step %c1_i32_15 iter_args(%arg4 = %12) -> (vector<8x128xf32>)  : i32 {
      %45 = arith.index_cast %arg3 : i32 to index
      %c12 = arith.constant 12 : index
      %c0_22 = arith.constant 0 : index
      %c0_23 = arith.constant 0 : index
      %46 = vector.load %arg1[%45, %c12, %c0_22, %c0_23] : memref<16x15x8x128xf32, #tpu.memory_space<vmem>>, vector<1x1x8x128xf32>
      %47 = vector.shape_cast %46 : vector<1x1x8x128xf32> to vector<8x128xf32>
      %48 = arith.subf %47, %29 : vector<8x128xf32>
      %49 = arith.mulf %48, %48 : vector<8x128xf32>
      %50 = arith.addf %arg4, %49 : vector<8x128xf32>
      %51 = arith.index_cast %arg3 : i32 to index
      %c13 = arith.constant 13 : index
      %c0_24 = arith.constant 0 : index
      %c0_25 = arith.constant 0 : index
      %52 = vector.load %arg1[%51, %c13, %c0_24, %c0_25] : memref<16x15x8x128xf32, #tpu.memory_space<vmem>>, vector<1x1x8x128xf32>
      %53 = vector.shape_cast %52 : vector<1x1x8x128xf32> to vector<8x128xf32>
      %54 = arith.subf %53, %31 : vector<8x128xf32>
      %55 = arith.mulf %54, %54 : vector<8x128xf32>
      %56 = arith.addf %50, %55 : vector<8x128xf32>
      %57 = arith.index_cast %arg3 : i32 to index
      %c14 = arith.constant 14 : index
      %c0_26 = arith.constant 0 : index
      %c0_27 = arith.constant 0 : index
      %58 = vector.load %arg1[%57, %c14, %c0_26, %c0_27] : memref<16x15x8x128xf32, #tpu.memory_space<vmem>>, vector<1x1x8x128xf32>
      %59 = vector.shape_cast %58 : vector<1x1x8x128xf32> to vector<8x128xf32>
      %60 = arith.subf %59, %33 : vector<8x128xf32>
      %61 = arith.mulf %60, %60 : vector<8x128xf32>
      %62 = arith.addf %56, %61 : vector<8x128xf32>
      scf.yield %62 : vector<8x128xf32>
    }
    %c16_i32_16 = arith.constant 16 : i32
    %cst_17 = arith.constant 0.0666666701 : f32
    %36 = vector.broadcast %cst_17 : f32 to vector<8x128xf32>
    %37 = arith.mulf %35, %36 : vector<8x128xf32>
    %38 = arith.mulf %37, %15#4 : vector<8x128xf32>
    %c4 = arith.constant 4 : index
    %c0_18 = arith.constant 0 : index
    %c0_19 = arith.constant 0 : index
    %39 = vector.load %arg2[%c4, %c0_18, %c0_19] : memref<6x8x128xf32, #tpu.memory_space<vmem>>, vector<1x8x128xf32>
    %40 = vector.shape_cast %39 : vector<1x8x128xf32> to vector<8x128xf32>
    %41 = vector.shape_cast %38 : vector<8x128xf32> to vector<1x8x128xf32>
    tpu.vector_store %arg2[%c4, %c0_18, %c0_19], %41 {strides = array<i32>} : memref<6x8x128xf32, #tpu.memory_space<vmem>>, vector<1x8x128xf32>,
    %c5 = arith.constant 5 : index
    %c0_20 = arith.constant 0 : index
    %c0_21 = arith.constant 0 : index
    %42 = vector.load %arg2[%c5, %c0_20, %c0_21] : memref<6x8x128xf32, #tpu.memory_space<vmem>>, vector<1x8x128xf32>
    %43 = vector.shape_cast %42 : vector<1x8x128xf32> to vector<8x128xf32>
    %44 = vector.shape_cast %15#4 : vector<8x128xf32> to vector<1x8x128xf32>
    tpu.vector_store %arg2[%c5, %c0_20, %c0_21], %44 {strides = array<i32>} : memref<6x8x128xf32, #tpu.memory_space<vmem>>, vector<1x8x128xf32>,
    return
  }
  func.func @transform_0(%arg0: i32) -> (i32, i32, i32, i32) {
    %c0_i32 = arith.constant 0 : i32
    %c0_i32_0 = arith.constant 0 : i32
    %c0_i32_1 = arith.constant 0 : i32
    %c0_i32_2 = arith.constant 0 : i32
    return %c0_i32, %c0_i32_0, %arg0, %c0_i32_1 : i32, i32, i32, i32
  }
  func.func @transform_1(%arg0: i32) -> (i32, i32, i32) {
    %c0_i32 = arith.constant 0 : i32
    %c0_i32_0 = arith.constant 0 : i32
    %c0_i32_1 = arith.constant 0 : i32
    return %c0_i32, %arg0, %c0_i32_0 : i32, i32, i32
  }
}

</mosaic_0001>

<bundles_post_ra>
// kernel: tpu_custom_call.1
= control target key start
LH: loop header
LB: loop body
LE: loop exit
PB: predicated region body
PF: predicated region fallthrough
CT: control target
= control target key end

     0   :  { %6 = vsyncpa [#allocation3], 0  ;;  %s668_s0 = inlined_call_operand.hbm [shape: f32[16,15,8,128], index: 0, kind: input, shape index: {}]   ;;  %s669_s1 = inlined_call_operand.hbm [shape: f32[6,8,128], index: 1, kind: output, shape index: {}]  }
   0x1   :  { %7 = vsyncpa [#allocation4], 0  ;;  %s542_s6 = smov [#allocation2]   ;;  %s406_s10 = scalar_lea.hbm %s668_s0, 30720 }
   0x2   :  { %s13_s7 = sshll.u32 %s542_s6, 4  ;;  %p407_p0 = scmp.ne.s32.totalorder %s668_s0, %s406_s10  ;;  %s14_s7 = int_to_ptr.vmem [resolvable:$true] %s13_s7 }
   0x3   :  { %p410_p1 = scmp.lt.u32.totalorder %s406_s10, %s668_s0 }
   0x5   :  { %p412_p2 = pnand %p410_p1, %p407_p0 }
   0x7   :  { %415 = shalt.err (!%p412_p2)
}
   0x8   :  { %s416_s15 = scalar_lea.vmem %s14_s7, 30720  ;;  %p421_p4 = scmp.lt.s32.totalorder %s14_s7, %s14_s7 }
   0x9   :  { %p417_p3 = scmp.ne.s32.totalorder %s14_s7, %s416_s15  ;;  %p422_p5 = scmp.lt.s32.totalorder %s416_s15, %s416_s15 }
   0xb   :  { %p423_p6 = por %p422_p5, %p421_p4 }
   0xd   :  { %p424_p7 = pnand %p423_p6, %p417_p3 }
   0xf   :  { %427 = shalt.err (!%p424_p7)
}
  0x10   :  { %s543_s16 = smov 128   ;;  %s544_s17 = smov 8  }
  0x11   :  { %19 = dma.hbm_to_vmem [thread:$0]  %s668_s0, 30720, %s14_s7, [#allocation3], %s543_s16, %s543_s16, %s544_s17  }
  0x12   :  { %494 = dma.done.wait [#allocation3], 30720  }
  0x13   :  { %495 = vsyncadd [#allocation3], 4294936576  ;;  %v23_v0 = vlaneseq  ;;  %v545_v5 = vmov 0.0   ;;  %v574_v7 = vmov 0.0   ;;  %v576_v8 = vmov 0.0   ;;  %s590_s0 = smov 0  }
  0x14   :  { %v578_v9 = vmov 0.0   ;;  %v580_v10 = vmov 1.0   ;;  %v582_v11 = vmov 0.0   ;;  %v584_v12 = vmov 0.0  }
  0x15   :  { %v24_v1 = vshrl.u32 %v23_v0, 7  ;;  %v26_v2 = vand.u32 127, %v23_v0  ;;  %v586_v13 = vmov 0.0   ;;  %v588_v14 = vmov 0.0  }
  0x17   :  { %v30_v3 = vmul.u32 128, %v24_v1 }
  0x19   :  { %v31_v4 = vadd.s32 %v30_v3, %v26_v2 }
  0x1b   :  { %vm32_vm0 = vcmp.lt.s32.totalorder %v31_v4, 32 }
  0x1c   :  { %v572_v6 = vsel %vm32_vm0, 1.0, %v545_v5 }
  0x1d LB: > { %s49_s20 = smul.u32 120, %s532_s0  ;;  %s40_s0 = sadd.s32 1, %s532_s0   ;;  %s532_s0 = sphi %s590_s0, %s40_s0   ;;  %v528_v14 = vphi %v588_v14, %v679_v14   ;;  %v524_v13 = vphi %v586_v13, %v678_v13   ;;  %v520_v12 = vphi %v584_v12, %v677_v12   ;;  %v516_v11 = vphi %v582_v11, %v676_v11   ;;  %v512_v10 = vphi %v580_v10, %v675_v10   ;;  %v508_v9 = vphi %v578_v9, %v674_v9   ;;  %v504_v8 = vphi %v576_v8, %v673_v8   ;;  %v500_v7 = vphi %v574_v7, %v672_v7  }
  0x1e   : > { %p37_p8 = scmp.ge.s32.totalorder %s40_s0, 16  }
  0x1f   : > { %s606_s21 = scalar_lea.vmem [#allocation2], %s49_s20  ;;  %s538_s22 = smov (%p37_p8), 0  }
  0x20   : > { %v292_v15 = vld [vmem:[%s606_s21 + $0x48] sm:$0xff]  ;;  %v294_v16 = vld [vmem:[%s606_s21 + $0x58] sm:$0xff]  ;;  %v295_v17 = vld [vmem:[%s606_s21 + $0x30] sm:$0xff] }
  0x21   : > { %v63_v18 = vld [vmem:[%s606_s21] sm:$0xff]  ;;  %v296_v19 = vld [vmem:[%s606_s21 + $0x18] sm:$0xff]  ;;  %v613_v14 = vadd.f32 %v528_v14, %v292_v15   ;;  %v108_v21 = vmul.f32 -50.0, %v294_v16  ;;  %v615_v10 = vmin.f32 %v512_v10, %v292_v15   ;;  %v298_v26 = vld [vmem:[%s606_s21 + $0x8] sm:$0xff] }
  0x22   : > { %v64_v23 = vsub.f32 %v63_v18, %v295_v17  ;;  %v70_v24 = vsub.f32 %v296_v19, %v295_v17  ;;  %v297_v25 = vld [vmem:[%s606_s21 + $0x38] sm:$0xff]  ;;  %v299_v27 = vld [vmem:[%s606_s21 + $0x20] sm:$0xff]  ;;  %v301_v31 = vld [vmem:[%s606_s21 + $0x10] sm:$0xff]  ;;  %v534_v18 = vmov (%p37_p8), 0.0  }
  0x23   : > { %v670_v20 = vmov %v613_v14  ;;  %v671_v22 = vmov %v615_v10  ;;  %v79_v28 = vsub.f32 %v298_v26, %v297_v25  ;;  %v85_v29 = vsub.f32 %v299_v27, %v297_v25  ;;  %v300_v30 = vld [vmem:[%s606_s21 + $0x40] sm:$0xff]  ;;  %v302_v32 = vld [vmem:[%s606_s21 + $0x28] sm:$0xff]  ;;  %v305_v46 = vld [vmem:[%s606_s21 + $0x70] sm:$0xff] }
  0x24   : > { %v65_v33 = vand.u32 2147483647, %v64_v23  ;;  %v71_v34 = vand.u32 2147483647, %v70_v24  ;;  %v94_v35 = vsub.f32 %v301_v31, %v300_v30  ;;  %v100_v36 = vsub.f32 %v302_v32, %v300_v30  ;;  %v303_v37 = vld [vmem:[%s606_s21 + $0x60] sm:$0xff]  ;;  %v304_v38 = vld [vmem:[%s606_s21 + $0x68] sm:$0xff] }
  0x25   : > { %v80_v39 = vand.u32 2147483647, %v79_v28  ;;  %v86_v40 = vand.u32 2147483647, %v85_v29  ;;  %v112_v41 = vand.u32 2147483647, %v108_v21  ;;  %v133_v44 = vadd.f32 %v508_v9, %v303_v37  }
  0x26   : > { %v95_v42 = vand.u32 2147483647, %v94_v35  ;;  %v101_v43 = vand.u32 2147483647, %v100_v36  ;;  %v137_v45 = vadd.f32 %v504_v8, %v304_v38   ;;  %v141_v50 = vadd.f32 %v500_v7, %v305_v46   ;;  %v293_v61 = vld [vmem:[%s606_s21 + $0x50] sm:$0xff]  ;;  %142 = vst [vmem:[#allocation5] sm:$0xff] (%p37_p8), %v670_v20 }
  0x27   : > { %v81_v47 = vadd.f32 %v80_v39, %v65_v33  ;;  %v87_v48 = vadd.f32 %v86_v40, %v71_v34  ;;  %v113_v49 = vsub.f32 0.0, %v112_v41  ;;  %v109_v63 = vmax.f32 %v108_v21, 0.0 }
  0x28   : > { %v110_v0 = vmul.f32 %v293_v61, %v108_v21  ;;  %v126_v7 = vsub.f32 %v572_v6, %v292_v15  ;;  %v679_v14 = vmov %v670_v20  ;;  %v151_v17 = vmul.f32 (%p37_p8), 0.0625, %v141_v50 }
  0x29   : > { %v96_v51 = vadd.f32 %v95_v42, %v81_v47  ;;  %v102_v52 = vadd.f32 %v101_v43, %v87_v48  ;;  %v114_v53 = vmul.f32 1.442695, %v113_v49  ;;  %v149_v14 = vmul.f32 (%p37_p8), 0.0625, %v133_v44 }
  0x2a   : > { %v111_v4 = vsub.f32 %v109_v63, %v110_v0 }
  0x2b   : > { %v104_v54 = vmul.f32 %v292_v15, %v96_v51  ;;  %v106_v55 = vmul.f32 %v292_v15, %v102_v52  ;;  %402 = vpow2.f32 %v114_v53  ;;  %v150_v15 = vmul.f32 (%p37_p8), 0.0625, %v137_v45 }
  0x2d   : > { %v105_v56 = vadd.f32 %v524_v13, %v104_v54   ;;  %v107_v57 = vadd.f32 %v520_v12, %v106_v55  }
  0x2f   : > { %v677_v12 = vmov %v107_v57  ;;  %v678_v13 = vmov %v105_v56  ;;  %144 = vst [vmem:[#allocation5 + $0x8] sm:$0xff] (%p37_p8), %v105_v56  ;;  %146 = vst [vmem:[#allocation5 + $0x10] sm:$0xff] (%p37_p8), %v107_v57 }
  0x35   : > { %v403_v58 = vpop.eup %402 }
  0x36   : > { %v116_v59 = vadd.f32 1.0, %v403_v58  ;;  %v119_v60 = vmul.f32 -0.5, %v403_v58  ;;  %v122_v1 = vand.u32 2147483647, %v403_v58 }
  0x38   : > { %404 = vlog2.f32 %v116_v59  ;;  %v120_v62 = vadd.f32 1.0, %v119_v60  ;;  %vm123_vm1 = vcmp.lt.f32.partialorder %v122_v1, 0.0004427343 }
  0x3a   : > { %v121_v2 = vmul.f32 %v403_v58, %v120_v62 }
  0x42   : > { %v405_v3 = vpop.eup %404 }
  0x43   : > { %v118_v5 = vmul.f32 0.6931472, %v405_v3 }
  0x45   : > { %v124_v8 = vsel %vm123_vm1, %v121_v2, %v118_v5 }
  0x46   : > { %v125_v9 = vadd.f32 %v124_v8, %v111_v4  ;;  %v673_v8 = vmov %v137_v45  ;;  %39 = sbr.rel (!%p37_p8) target bundleno = 29 (0x1d), region = 65 }
  0x48   : > { %v127_v10 = vmul.f32 %v126_v7, %v125_v9  ;;  %v672_v7 = vmov %v141_v50  ;;  %v674_v9 = vmov %v133_v44 }
  0x4a   : > { %v128_v16 = vadd.f32 %v516_v11, %v127_v10   ;;  %v675_v10 = vmov %v671_v22 }
  0x4c   : > { %v676_v11 = vmov %v128_v16  ;;  %148 = vst [vmem:[#allocation5 + $0x18] sm:$0xff] (%p37_p8), %v128_v16 }
  0x4d LB: > { %s245_s23 = smul.u32 120, %s540_s22  ;;  %s157_s22 = sadd.s32 1, %s540_s22   ;;  %s540_s22 = sphi %s538_s22, %s157_s22   ;;  %v536_v18 = vphi %v534_v18, %v535_v18  }
  0x4e   : > { %p154_p9 = scmp.ge.s32.totalorder %s157_s22, 16  }
  0x4f   : > { %s246_s24 = scalar_lea.vmem [#allocation2], %s245_s23  ;;  %183 = vst [vmem:[#allocation5 + $0x28] sm:$0xff] (%p154_p9), %v671_v22  ;;  %s546_s25 = smov (%p154_p9), [#allocation5]  }
  0x50   : > { %v306_v19 = vld [vmem:[%s246_s24 + $0x60] sm:$0xff]  ;;  %v307_v21 = vld [vmem:[%s246_s24 + $0x68] sm:$0xff]  ;;  %v308_v23 = vld [vmem:[%s246_s24 + $0x70] sm:$0xff]  ;;  %s189_s26 = sshll.u32 (%p154_p9), %s546_s25, 4  ;;  %s190_s26 = int_to_ptr.vmem [resolvable:$true] %s189_s26 }
  0x51   : > { %v163_v24 = vsub.f32 %v306_v19, %v149_v14  ;;  %v169_v6 = vsub.f32 %v307_v21, %v150_v15  ;;  %v175_v11 = vsub.f32 %v308_v23, %v151_v17  ;;  %s428_s27 = scalar_lea.vmem (%p154_p9), %s190_s26, 768  ;;  %p433_p11 = scmp.lt.s32.totalorder (%p154_p9), %s190_s26, %s190_s26 }
  0x52   :  { %p429_p10 = scmp.ne.s32.totalorder (%p154_p9), %s190_s26, %s428_s27  ;;  %p434_p12 = scmp.lt.s32.totalorder (%p154_p9), %s428_s27, %s428_s27 }
  0x53   : > { %v164_v12 = vmul.f32 %v163_v24, %v163_v24  ;;  %v170_v13 = vmul.f32 %v169_v6, %v169_v6  ;;  %v176_v25 = vmul.f32 %v175_v11, %v175_v11 }
  0x54   :  { %p435_p13 = por (%p154_p9), %p434_p12, %p433_p11 }
  0x55   : > { %v165_v20 = vadd.f32 %v536_v18, %v164_v12  ;;  %156 = sbr.rel (!%p154_p9) target bundleno = 77 (0x4d), region = 76 }
  0x56   :  { %p436_p0 = pnand (%p154_p9), %p435_p13, %p429_p10 }
  0x57   : > { %v171_v26 = vadd.f32 %v170_v13, %v165_v20 }
  0x59   : > { %v177_v27 = vadd.f32 %v176_v25, %v171_v26  }
  0x5b   : > { %v535_v18 = vmov %v177_v27   ;;  %v178_v28 = vmul.f32 (%p154_p9), 0.06666667, %v177_v27 }
  0x5d   :  { %v179_v29 = vmul.f32 %v178_v28, %v671_v22 }
  0x5f   :  { %181 = vst [vmem:[#allocation5 + $0x20] sm:$0xff] %v179_v29 }
  0x60   :  { %439 = shalt.err (!%p436_p0)
}
  0x61   :  { %s440_s30 = scalar_lea.hbm %s669_s1, 768 }
  0x62   :  { %p441_p1 = scmp.ne.s32.totalorder %s669_s1, %s440_s30  ;;  %p444_p2 = scmp.lt.u32.totalorder %s440_s30, %s669_s1 }
  0x64   :  { %p446_p3 = pnand %p444_p2, %p441_p1 }
  0x66   :  { %449 = shalt.err (!%p446_p3)
}
  0x67   :  { %195 = dma.vmem_to_hbm [thread:$0]  %s190_s26, 768, %s669_s1, [#allocation4], %s543_s16, %s543_s16, %s544_s17  }
  0x68   :  { %496 = dma.done.wait [#allocation4], 768  }
  0x69   :  { %497 = vsyncadd [#allocation4], 4294966528 }
  0x6a   :  { %199 = vsyncpa [#allocation3], 1 }
  0x6b   :  { %200 = vsyncpa [#allocation4], 1 }

</bundles_post_ra>
